<compile_context>
chip_gen: v7x
topology: tpu7x:2x2x1
jax: 0.10.0
libtpu: 0.0.40
codegen_flags: <defaults>
</compile_context>

<pallas_src>
import functools

import jax
import jax.numpy as jnp
from jax.experimental import pallas as pl
from jax.experimental.pallas import tpu as pltpu


def _up_conv_kernel(x_ref, w_ref, scale_ref, shift_ref, o_ref, *,
                    TILE_H, W_P, C_in, C_out):
    # x_ref:     (1, 1, TILE_H+2, W_P+2, C_in)  bf16  zero-padded NHWC row tile
    # w_ref:     (9*C_in, 4*C_out)              bf16  9-tap / 4-phase conv weights
    # scale_ref: (1, 4*C_out)                   f32   BN scale (gamma/sqrt(var+eps))
    # shift_ref: (1, 4*C_out)                   f32   BN shift (+ folded conv bias)
    # o_ref:     (1, TILE_H, W_P, 4*C_out)      bf16  phase-packed output tile
    x = x_ref[0, 0]                                           # bf16, no upcast
    taps = [x[ty:ty + TILE_H, tx:tx + W_P, :]
            for ty in range(3) for tx in range(3)]
    patch = jnp.concatenate(taps, axis=-1)                    # (TH, W_P, 9*C_in)
    patch = patch.reshape(TILE_H * W_P, 9 * C_in)             # layout-ok: W_P % 16 == 0
    acc = jnp.dot(patch, w_ref[...],
                  preferred_element_type=jnp.float32)         # (TH*W_P, 4*C_out)
    acc = jnp.maximum(acc * scale_ref[...] + shift_ref[...], 0.0)   # f32 BN + ReLU
    o_ref[0] = acc.reshape(TILE_H, W_P, 4 * C_out).astype(o_ref.dtype)


def _round_up(v, m):
    return ((v + m - 1) // m) * m


def _vmem_limit_bytes():
    """Generation-aware scoped-VMEM request (v7x: 64 MiB/TC, v5e/v6e: 128 MiB)."""
    try:
        cap = pltpu.get_tpu_info().vmem_capacity_bytes
    except Exception:
        cap = 64 * 1024 * 1024            # conservative (v7x-sized) fallback
    return max(32 * 1024 * 1024, min(int(cap) * 3 // 4, 112 * 1024 * 1024))


def _pick_tile_h(H, W_P, C_in, C_out, budget_bytes):
    """Largest row tile whose per-step VMEM footprint fits the budget."""
    def footprint(th):
        inp = 2 * (th + 2) * (W_P + 2) * C_in * 2     # bf16 input, double-buffered
        outp = 2 * th * W_P * 4 * C_out * 2           # bf16 output, double-buffered
        patch = th * W_P * 9 * C_in * 2               # bf16 im2col temporary
        acc = th * W_P * 4 * C_out * 4                # f32 matmul/epilogue temp
        wts = 2 * (9 * C_in * 4 * C_out * 2 + 2 * 4 * C_out * 4)
        return inp + outp + patch + acc + wts
    th = min(H, 256)
    while th > 8 and footprint(th) > budget_bytes:
        th = (th + 1) // 2
    return max(1, min(th, H))


def up_conv_forward(x_nchw, w, b, gamma, beta, run_mean, run_var, eps=1e-5):
    """Pallas implementation of up_conv.forward. x_nchw: (N, C_in, H, W) -> f32 NCHW."""
    N, C_in, H, W = x_nchw.shape
    C_out = w.shape[0]

    W_P = _round_up(W, 16)                       # lane/sublane-friendly width
    vmem_limit = _vmem_limit_bytes()
    TILE_H = _pick_tile_h(H, W_P, C_in, C_out, budget_bytes=vmem_limit * 6 // 10)
    T = -(-H // TILE_H)                          # cdiv row grid (tail is padded)
    H_pad = T * TILE_H

    # ---- input prep: original resolution only (no materialized upsample) ----
    x_nhwc = jnp.transpose(x_nchw, (0, 2, 3, 1)).astype(jnp.bfloat16)
    x_pad = jnp.pad(x_nhwc, ((0, 0),
                             (1, 1 + (H_pad - H)),
                             (1, 1 + (W_P - W)),
                             (0, 0)))            # (N, H_pad+2, W_P+2, C_in), zeros
    # row tiles with a duplicated 2-row halo -> non-overlapping BlockSpec blocks
    x_tiles = jnp.stack(
        [x_pad[:, t * TILE_H:t * TILE_H + TILE_H + 2] for t in range(T)],
        axis=1)                                  # (N, T, TILE_H+2, W_P+2, C_in)

    # ---- weights: 9-tap / 4-phase decomposition of (nearest x2 -> 3x3 conv) ----
    w_hwio = jnp.transpose(w, (2, 3, 1, 0)).astype(jnp.float32)       # (3,3,Ci,Co)
    # Q[a, t, dy]: contribution of original kernel row dy to window tap t for
    # output-row parity a (derived from nearest-neighbour x2 upsampling + pad 1).
    Q = jnp.array([[[1., 0., 0.], [0., 1., 1.], [0., 0., 0.]],
                   [[0., 0., 0.], [1., 1., 0.], [0., 0., 1.]]], jnp.float32)
    w9 = jnp.einsum('atd,bue,deio->tuiabo', Q, Q, w_hwio)             # (3,3,Ci,2,2,Co)
    w9 = w9.reshape(9 * C_in, 4 * C_out).astype(jnp.bfloat16)

    scale = (gamma / jnp.sqrt(run_var + eps)).astype(jnp.float32)     # f32 epilogue
    shift = (beta + (b - run_mean) * scale).astype(jnp.float32)
    scale4 = jnp.tile(scale, 4).reshape(1, 4 * C_out)
    shift4 = jnp.tile(shift, 4).reshape(1, 4 * C_out)

    kernel = functools.partial(_up_conv_kernel, TILE_H=TILE_H, W_P=W_P,
                               C_in=C_in, C_out=C_out)

    out_ph = pl.pallas_call(
        kernel,
        out_shape=jax.ShapeDtypeStruct((N, H_pad, W_P, 4 * C_out), jnp.bfloat16),
        grid_spec=pltpu.PrefetchScalarGridSpec(
            num_scalar_prefetch=0,
            grid=(N, T),
            in_specs=[
                pl.BlockSpec((1, 1, TILE_H + 2, W_P + 2, C_in),
                             lambda n, t: (n, t, 0, 0, 0)),
                pl.BlockSpec((9 * C_in, 4 * C_out), lambda n, t: (0, 0)),
                pl.BlockSpec((1, 4 * C_out), lambda n, t: (0, 0)),
                pl.BlockSpec((1, 4 * C_out), lambda n, t: (0, 0)),
            ],
            out_specs=pl.BlockSpec((1, TILE_H, W_P, 4 * C_out),
                                   lambda n, t: (n, t, 0, 0)),
        ),
        compiler_params=pltpu.CompilerParams(
            dimension_semantics=("parallel", "parallel"),
            vmem_limit_bytes=vmem_limit),
    )(x_tiles, w9, scale4, shift4)

    # phase interleave + NHWC->NCHW + f32 cast, fused into one XLA transpose:
    # o[n,i,j,a,b,c] -> y[n,c,2i+a,2j+b]
    o = out_ph[:, :H, :W, :].reshape(N, H, W, 2, 2, C_out)
    y = jnp.transpose(o, (0, 5, 1, 3, 2, 4)).astype(jnp.float32)
    return y.reshape(N, C_out, 2 * H, 2 * W)


def _reference_forward(x, w, b, gamma, beta, rm, rv, eps=1e-5):
    """Pure-JAX reference mirroring the PyTorch module (inference-mode BN)."""
    x_up = jnp.repeat(jnp.repeat(x, 2, axis=2), 2, axis=3)
    y = jax.lax.conv_general_dilated(
        x_up.astype(jnp.float32), w.astype(jnp.float32),
        window_strides=(1, 1), padding=((1, 1), (1, 1)),
        dimension_numbers=('NCHW', 'OIHW', 'NCHW'))
    y = y + b[None, :, None, None]
    inv = (gamma / jnp.sqrt(rv + eps))[None, :, None, None]
    y = (y - rm[None, :, None, None]) * inv + beta[None, :, None, None]
    return jnp.maximum(y, 0.0)


if __name__ == "__main__":
    key = jax.random.PRNGKey(0)
    k_x, k_w, k_b, k_g, k_be, k_m, k_v = jax.random.split(key, 7)

    N, C_in, C_out, H, W = 2, 4, 8, 8, 8      # upsampled spatial = 16x16

    x = jax.random.normal(k_x, (N, C_in, H, W), jnp.float32)
    w = jax.random.normal(k_w, (C_out, C_in, 3, 3), jnp.float32) * 0.1
    b = jax.random.normal(k_b, (C_out,), jnp.float32) * 0.1
    gamma = 1.0 + 0.1 * jax.random.normal(k_g, (C_out,), jnp.float32)
    beta = 0.1 * jax.random.normal(k_be, (C_out,), jnp.float32)
    run_mean = 0.1 * jax.random.normal(k_m, (C_out,), jnp.float32)
    run_var = jnp.abs(jax.random.normal(k_v, (C_out,), jnp.float32)) + 0.5

    out = jax.block_until_ready(
        jax.jit(up_conv_forward)(x, w, b, gamma, beta, run_mean, run_var))
    ref = _reference_forward(x, w, b, gamma, beta, run_mean, run_var)
    assert out.shape == (N, C_out, 2 * H, 2 * W)
    assert out.dtype == jnp.float32
    # bf16 MXU inputs / bf16 kernel output -> loosened tolerance vs f32 reference
    assert jnp.allclose(out, ref, rtol=3e-2, atol=3e-2), "mismatch vs reference"

    # odd spatial / channel sizes exercise the W/H padding and the cdiv row grid
    N2, C_in2, C_out2, H2, W2 = 1, 3, 8, 7, 7
    ks = jax.random.split(jax.random.PRNGKey(1), 7)
    x2 = jax.random.normal(ks[0], (N2, C_in2, H2, W2), jnp.float32)
    w2 = jax.random.normal(ks[1], (C_out2, C_in2, 3, 3), jnp.float32) * 0.1
    b2 = jax.random.normal(ks[2], (C_out2,), jnp.float32) * 0.1
    g2 = 1.0 + 0.1 * jax.random.normal(ks[3], (C_out2,), jnp.float32)
    be2 = 0.1 * jax.random.normal(ks[4], (C_out2,), jnp.float32)
    m2 = 0.1 * jax.random.normal(ks[5], (C_out2,), jnp.float32)
    v2 = jnp.abs(jax.random.normal(ks[6], (C_out2,), jnp.float32)) + 0.5
    out2 = jax.block_until_ready(
        jax.jit(up_conv_forward)(x2, w2, b2, g2, be2, m2, v2))
    ref2 = _reference_forward(x2, w2, b2, g2, be2, m2, v2)
    assert out2.shape == (N2, C_out2, 2 * H2, 2 * W2)
    assert jnp.allclose(out2, ref2, rtol=3e-2, atol=3e-2), "mismatch (odd shapes)"

    print("KERNEL_OK")
</pallas_src>

<mosaic_0001>
module attributes {stable_mosaic.version = 11 : i64} {
  func.func @_up_conv_kernel(%arg0: i32, %arg1: i32, %arg2: memref<1x1x10x18x4xbf16, #tpu.memory_space<vmem>>, %arg3: memref<36x32xbf16, #tpu.memory_space<vmem>>, %arg4: memref<1x32xf32, #tpu.memory_space<vmem>>, %arg5: memref<1x32xf32, #tpu.memory_space<vmem>>, %arg6: memref<1x8x16x32xbf16, #tpu.memory_space<vmem>>) attributes {dimension_semantics = [#tpu.dimension_semantics<parallel>, #tpu.dimension_semantics<parallel>], iteration_bounds = array<i64: 2, 1>, scalar_prefetch = 0 : i64, scratch_operands = 0 : i64, tpu.core_type = #tpu.core_type<tc>, window_params = [{transform_indices = @transform_0, window_bounds = array<i64: 1, 1, 10, 18, 4>}, {pipeline_mode = #tpu.pipeline_mode<synchronous>, transform_indices = @transform_1, window_bounds = array<i64: 36, 32>}, {pipeline_mode = #tpu.pipeline_mode<synchronous>, transform_indices = @transform_2, window_bounds = array<i64: 1, 32>}, {pipeline_mode = #tpu.pipeline_mode<synchronous>, transform_indices = @transform_3, window_bounds = array<i64: 1, 32>}, {transform_indices = @transform_4, window_bounds = array<i64: 1, 8, 16, 32>}]} {
    %c0 = arith.constant 0 : index
    %c0_0 = arith.constant 0 : index
    %c0_1 = arith.constant 0 : index
    %c0_2 = arith.constant 0 : index
    %c0_3 = arith.constant 0 : index
    %0 = vector.load %arg2[%c0, %c0_0, %c0_1, %c0_2, %c0_3] : memref<1x1x10x18x4xbf16, #tpu.memory_space<vmem>>, vector<1x1x10x18x4xbf16>
    %1 = vector.shape_cast %0 : vector<1x1x10x18x4xbf16> to vector<10x18x4xbf16>
    %2 = vector.extract_strided_slice %1 {offsets = [0, 0, 0], sizes = [8, 16, 4], strides = [1, 1, 1]} : vector<10x18x4xbf16> to vector<8x16x4xbf16>
    %3 = vector.extract_strided_slice %1 {offsets = [0, 1, 0], sizes = [8, 16, 4], strides = [1, 1, 1]} : vector<10x18x4xbf16> to vector<8x16x4xbf16>
    %4 = vector.extract_strided_slice %1 {offsets = [0, 2, 0], sizes = [8, 16, 4], strides = [1, 1, 1]} : vector<10x18x4xbf16> to vector<8x16x4xbf16>
    %5 = vector.extract_strided_slice %1 {offsets = [1, 0, 0], sizes = [8, 16, 4], strides = [1, 1, 1]} : vector<10x18x4xbf16> to vector<8x16x4xbf16>
    %6 = vector.extract_strided_slice %1 {offsets = [1, 1, 0], sizes = [8, 16, 4], strides = [1, 1, 1]} : vector<10x18x4xbf16> to vector<8x16x4xbf16>
    %7 = vector.extract_strided_slice %1 {offsets = [1, 2, 0], sizes = [8, 16, 4], strides = [1, 1, 1]} : vector<10x18x4xbf16> to vector<8x16x4xbf16>
    %8 = vector.extract_strided_slice %1 {offsets = [2, 0, 0], sizes = [8, 16, 4], strides = [1, 1, 1]} : vector<10x18x4xbf16> to vector<8x16x4xbf16>
    %9 = vector.extract_strided_slice %1 {offsets = [2, 1, 0], sizes = [8, 16, 4], strides = [1, 1, 1]} : vector<10x18x4xbf16> to vector<8x16x4xbf16>
    %10 = vector.extract_strided_slice %1 {offsets = [2, 2, 0], sizes = [8, 16, 4], strides = [1, 1, 1]} : vector<10x18x4xbf16> to vector<8x16x4xbf16>
    %11 = tpu.concatenate %2, %3, %4, %5, %6, %7, %8, %9, %10 in 2 : vector<8x16x4xbf16>, vector<8x16x4xbf16>, vector<8x16x4xbf16>, vector<8x16x4xbf16>, vector<8x16x4xbf16>, vector<8x16x4xbf16>, vector<8x16x4xbf16>, vector<8x16x4xbf16>, vector<8x16x4xbf16> -> vector<8x16x36xbf16>
    %12 = vector.shape_cast %11 : vector<8x16x36xbf16> to vector<128x36xbf16>
    %c0_4 = arith.constant 0 : index
    %c0_5 = arith.constant 0 : index
    %13 = vector.load %arg3[%c0_4, %c0_5] : memref<36x32xbf16, #tpu.memory_space<vmem>>, vector<36x32xbf16>
    %cst = arith.constant dense<0.000000e+00> : vector<128x32xf32>
    %14 = tpu.matmul %12, %13, %cst {dimension_numbers = #tpu.dot_dimension_numbers<[1], [0], [0], [1], [0, 0, 1, 1], [], []>} : vector<128x36xbf16>, vector<36x32xbf16>, vector<128x32xf32> -> vector<128x32xf32>
    %c0_6 = arith.constant 0 : index
    %c0_7 = arith.constant 0 : index
    %15 = vector.load %arg4[%c0_6, %c0_7] : memref<1x32xf32, #tpu.memory_space<vmem>>, vector<1x32xf32>
    %16 = vector.broadcast %15 : vector<1x32xf32> to vector<128x32xf32>
    %17 = arith.mulf %14, %16 : vector<128x32xf32>
    %c0_8 = arith.constant 0 : index
    %c0_9 = arith.constant 0 : index
    %18 = vector.load %arg5[%c0_8, %c0_9] : memref<1x32xf32, #tpu.memory_space<vmem>>, vector<1x32xf32>
    %19 = vector.broadcast %18 : vector<1x32xf32> to vector<128x32xf32>
    %20 = arith.addf %17, %19 : vector<128x32xf32>
    %cst_10 = arith.constant 0.000000e+00 : f32
    %21 = vector.broadcast %cst_10 : f32 to vector<128x32xf32>
    %22 = arith.maximumf %20, %21 : vector<128x32xf32>
    %23 = vector.shape_cast %22 : vector<128x32xf32> to vector<8x16x32xf32>
    %24 = arith.truncf %23 : vector<8x16x32xf32> to vector<8x16x32xbf16>
    %c0_11 = arith.constant 0 : index
    %c0_12 = arith.constant 0 : index
    %c0_13 = arith.constant 0 : index
    %c0_14 = arith.constant 0 : index
    %25 = vector.load %arg6[%c0_11, %c0_12, %c0_13, %c0_14] : memref<1x8x16x32xbf16, #tpu.memory_space<vmem>>, vector<1x8x16x32xbf16>
    %26 = vector.shape_cast %25 : vector<1x8x16x32xbf16> to vector<8x16x32xbf16>
    %27 = vector.shape_cast %24 : vector<8x16x32xbf16> to vector<1x8x16x32xbf16>
    tpu.vector_store %arg6[%c0_11, %c0_12, %c0_13, %c0_14], %27 {strides = array<i32>} : memref<1x8x16x32xbf16, #tpu.memory_space<vmem>>, vector<1x8x16x32xbf16>,
    return
  }
  func.func @transform_0(%arg0: i32, %arg1: i32) -> (i32, i32, i32, i32, i32) {
    %c0_i32 = arith.constant 0 : i32
    %c0_i32_0 = arith.constant 0 : i32
    %c0_i32_1 = arith.constant 0 : i32
    %c0_i32_2 = arith.constant 0 : i32
    return %arg0, %arg1, %c0_i32, %c0_i32_0, %c0_i32_1 : i32, i32, i32, i32, i32
  }
  func.func @transform_1(%arg0: i32, %arg1: i32) -> (i32, i32) {
    %c0_i32 = arith.constant 0 : i32
    %c0_i32_0 = arith.constant 0 : i32
    %c0_i32_1 = arith.constant 0 : i32
    return %c0_i32, %c0_i32_0 : i32, i32
  }
  func.func @transform_2(%arg0: i32, %arg1: i32) -> (i32, i32) {
    %c0_i32 = arith.constant 0 : i32
    %c0_i32_0 = arith.constant 0 : i32
    %c0_i32_1 = arith.constant 0 : i32
    return %c0_i32, %c0_i32_0 : i32, i32
  }
  func.func @transform_3(%arg0: i32, %arg1: i32) -> (i32, i32) {
    %c0_i32 = arith.constant 0 : i32
    %c0_i32_0 = arith.constant 0 : i32
    %c0_i32_1 = arith.constant 0 : i32
    return %c0_i32, %c0_i32_0 : i32, i32
  }
  func.func @transform_4(%arg0: i32, %arg1: i32) -> (i32, i32, i32, i32) {
    %c0_i32 = arith.constant 0 : i32
    %c0_i32_0 = arith.constant 0 : i32
    %c0_i32_1 = arith.constant 0 : i32
    return %arg0, %arg1, %c0_i32, %c0_i32_0 : i32, i32, i32, i32
  }
}

</mosaic_0001>

<bundles_post_ra>
// kernel: tile.18
= control target key start
LH: loop header
LB: loop body
LE: loop exit
PB: predicated region body
PF: predicated region fallthrough
CT: control target
= control target key end

     0   :  { %s22_s0 = inlined_call_operand.vmem [shape: f32[8], index: 0, kind: input, shape index: {}]   ;;  %s23_s1 = inlined_call_operand.vmem [shape: f32[4,8], index: 1, kind: output, shape index: {}]  }
   0x1   :  { %v4_v0 = vld [vmem:[%s22_s0] ss:$0 sm:$0xff] }
   0x2   :  { %5 = vst [vmem:[%s23_s1] sm:$0xf] %v4_v0 }

// kernel: tile.19
= control target key start
LH: loop header
LB: loop body
LE: loop exit
PB: predicated region body
PF: predicated region fallthrough
CT: control target
= control target key end

     0   :  { %vm7_vm0 = vcmask 64512   ;;  %s37_s8 = smov 8   ;;  %s38_s9 = smov 16   ;;  %vm13_vm1 = vcmask 261312   ;;  %vm19_vm2 = vcmask 195712   ;;  %vm25_vm3 = vcmask 130112   ;;  %s55_s0 = inlined_call_operand.vmem [shape: f32[4,8], index: 0, kind: input, shape index: {}]   ;;  %s56_s1 = inlined_call_operand.vmem [shape: f32[1,32], index: 1, kind: output, shape index: {}]  }
   0x1   :  { %v4_v0 = vld [vmem:[%s55_s0] sm:$0xf]  ;;  %s36_s0 = smov 24  }
   0x2   :  { %5 = vst [vmem:[#allocation1] sm:$0xf] %v4_v0 }
   0x9   :  { %v10_v1 = vld [vmem:[#allocation1 + $0x3] sm:$0x1]   ;;  %v22_v2 = vld [vmem:[#allocation1 + $0x1] sm:$0x1]   ;;  %v6_v3 = vld [vmem:[#allocation1] sm:$0x1]  }
   0xa   :  { %11 = vrot.lane.b32.xlu0 %v10_v1, %s36_s0  ;;  %23 = vrot.lane.b32.xlu1 %v22_v2, %s37_s8  ;;  %v16_v4 = vld [vmem:[#allocation1 + $0x2] sm:$0x1]   ;;  %8 = vst.msk [vmem:[#allocation0] sm:$0x1] %vm7_vm0, %v6_v3  }
   0xe   :  { %17 = vrot.lane.b32.xlu0 %v16_v4, %s38_s9 }
  0x7c   :  { %v12_v5 = vpop.permute.xlu0 %11   ;;  %v24_v6 = vpop.permute.xlu1 %23  }
  0x7d   :  { %14 = vst.msk [vmem:[#allocation0] sm:$0x1] %vm13_vm1, %v12_v5  }
  0x80   :  { %v18_v7 = vpop.permute.xlu0 %17  }
  0x81   :  { %20 = vst.msk [vmem:[#allocation0] sm:$0x1] %vm19_vm2, %v18_v7  }
  0x82   :  { %26 = vst.msk [vmem:[#allocation0] sm:$0x1] %vm25_vm3, %v24_v6  }
  0x89   :  { %v30_v8 = vld [vmem:[#allocation0] sm:$0x1] }
  0x8a   :  { %32 = vst [vmem:[%s56_s1] sm:$0x1] %v30_v8 }

// kernel: up_conv_forward.1
= control target key start
LH: loop header
LB: loop body
LE: loop exit
PB: predicated region body
PF: predicated region fallthrough
CT: control target
= control target key end

     0   :  { %s1371_s15 = smov 0   ;;  %s1373_s16 = smov 0   ;;  %s1798_s0 = inlined_call_operand.vmem [shape: bf16[2,1,10,18,4], index: 0, kind: input, shape index: {}]   ;;  %s1799_s1 = inlined_call_operand.vmem [shape: bf16[36,32], index: 1, kind: input, shape index: {}]   ;;  %s1800_s2 = inlined_call_operand.vmem [shape: f32[1,32], index: 2, kind: input, shape index: {}]   ;;  %s1801_s3 = inlined_call_operand.vmem [shape: f32[1,32], index: 3, kind: input, shape index: {}]   ;;  %s1802_s4 = inlined_call_operand.vmem [shape: bf16[2,8,16,32], index: 4, kind: output, shape index: {}]  }
   0x1   :  { %s1375_s17 = smov 0  }
   0x2 LB: > { %s26_s18 = sadd.s32 1, %s1332_s16  ;;  %p1145_p0 = scmp.ge.s32.totalorder %s1336_s17, 1  ;;  %s1336_s17 = sphi %s1375_s17, %s14_s17   ;;  %s1332_s16 = sphi %s1373_s16, %s1804_s16   ;;  %s1328_s15 = sphi %s1371_s15, %s1803_s15  }
   0x3   : > { %p28_p1 = scmp.ge.s32.totalorder %s26_s18, 2  ;;  %p182_p2 = scmp.lt.s32.totalorder %s1336_s17, 3 }
   0x5   : > { %s1806_s18 = smov (%p28_p1, %s26_s18), 0  ;;  %p183_p3 = pnand %p1145_p0, %p182_p2 }
   0x6   : > { %p217_p4 = scmp.lt.s32.totalorder (!%p183_p3), %s1328_s15, 1  ;;  %vm445_vm0 = vcmask (!%p183_p3), 1046528   ;;  %s1338_s23 = smov (!%p183_p3), 12   ;;  %vm332_vm1 = vsmask.f32 (!%p183_p3), 7424  ;;  %vm801_vm2 = vcmask (!%p183_p3), 1041408  }
   0x7   : > { %186 = sbr.rel (%p183_p3) target bundleno = 484 (0x1e4), region = 36  ;;  %s1339_s24 = smov (!%p183_p3), 8   ;;  %vm628_vm3 = vcmask (!%p183_p3), 31744   ;;  %vm645_vm4 = vcmask (!%p183_p3), 64512   ;;  %vm679_vm5 = vcmask (!%p183_p3), 130048   ;;  %vm662_vm6 = vcmask (!%p183_p3), 97280  }
   0x8   : > { %s1340_s25 = smov (!%p183_p3), 4   ;;  %s1341_s26 = smov (!%p183_p3), 16   ;;  %vm696_vm7 = vcmask (!%p183_p3), 162816   ;;  %vm713_vm8 = vcmask (!%p183_p3), 195584   ;;  %vm730_vm9 = vcmask (!%p183_p3), 228352   ;;  %vm747_vm10 = vcmask (!%p183_p3), 261120  }
   0x9   : > { %s1342_s27 = smov (!%p183_p3), 20   ;;  %s1343_s28 = smov (!%p183_p3), 24   ;;  %vm784_vm11 = vcmask (!%p183_p3), 293888   ;;  %vm1028_vm12 = vcmask (!%p183_p3), 257024  }
   0xa   : > { %s1344_s7 = smov (!%p183_p3), 28   ;;  %s1345_s10 = smov (!%p183_p3), 32  }
   0xe   : > { %s1808_s15 = smov (!%p217_p4, %s1328_s15), 1 }
   0xf   : > { %s1258_s19 = smul.u32 120, %s1808_s15 }
  0x11   : > { %s1395_s22 = scalar_lea.vmem %s1798_s0, %s1258_s19  ;;  %s1200_s19 = sshll.u32 %s1808_s15, 6 }
  0x12   : > { %v1398_v0 = vld [vmem:[%s1395_s22 + $0x3c] sm:$0xff]   ;;  %v1401_v1 = vld [vmem:[%s1395_s22 + $0xc] sm:$0xff]   ;;  %v1294_v3 = vld [vmem:[%s1395_s22 + $0x38] ss:$0 sps:$4 sm:$0x11]   ;;  %s1734_s21 = scalar_lea.vmem %s1802_s4, %s1200_s19 }
  0x13   : > { %499 = vrot.lane.b32.xlu1 %v1398_v0, %s1338_s23  ;;  %491 = vrot.lane.b32.xlu0 %v1401_v1, %s1338_s23  ;;  %v1408_v2 = vld [vmem:[%s1395_s22 + $0x30] sm:$0xff]   ;;  %v1412_v4 = vld [vmem:[%s1395_s22] sm:$0xff]   ;;  %v461_v5 = vrot.slane %v1398_v0, 1  ;;  %v459_v7 = vrot.slane %v1294_v3, 1  ;;  %v449_v9 = vrot.slane %v1401_v1, 1  ;;  %v346_v16 = vshrl.u32 %v1401_v1, 16 }
  0x14   : > { %v458_v6 = vrot.slane %v1408_v2, 1  ;;  %v1296_v8 = vld [vmem:[%s1395_s22 + $0x8] ss:$0 sps:$4 sm:$0x11]   ;;  %v446_v10 = vrot.slane %v1412_v4, 1  ;;  %v348_v17 = vshll.u32 %v1401_v1, 16 }
  0x15   : > { %v1297_v11 = vld [vmem:[%s1395_s22 + $0x44] ss:$0 sps:$4 sm:$0x11]   ;;  %v447_v13 = vrot.slane %v1296_v8, 1  ;;  %v334_v18 = vshrl.u32 %v1412_v4, 16  ;;  %v336_v22 = vshll.u32 %v1412_v4, 16 }
  0x16   : > { %v1421_v12 = vsel %vm445_vm0, %v458_v6, %v459_v7  ;;  %v1298_v14 = vld [vmem:[%s1395_s22 + $0x14] ss:$0 sps:$4 sm:$0x11]   ;;  %v462_v15 = vrot.slane %v1297_v11, 1  ;;  %v350_v24 = vrot.slane %v348_v17, 1  ;;  %v341_v25 = vshll.u32 %v1296_v8, 16 }
  0x17   : > { %478 = vrot.lane.b32.xlu1 %v1421_v12, %s1339_s24  ;;  %v448_v19 = vsel %vm445_vm0, %v446_v10, %v447_v13  ;;  %v450_v20 = vrot.slane %v1298_v14, 1  ;;  %v353_v21 = vshll.u32 %v1298_v14, 16  ;;  %v394_v26 = vshrl.u32 %v1398_v0, 16  ;;  %v1445_v39 = vld [vmem:[%s1395_s22 + $0x48] sm:$0xff]   ;;  %v1452_v46 = vld [vmem:[%s1395_s22 + $0x18] sm:$0xff]   ;;  %v1470_v57 = vld [vmem:[%s1395_s22 + $0x60] sm:$0xff]  }
  0x18   : > { %470 = vrot.lane.b32.xlu0 %v448_v19, %s1339_s24  ;;  %v1433_v23 = vsel %vm445_vm0, %v461_v5, %v462_v15  ;;  %v338_v29 = vrot.slane %v336_v22, 1  ;;  %v396_v30 = vshll.u32 %v1398_v0, 16  ;;  %v351_v31 = vor.u32 %v350_v24, %v346_v16  ;;  %v1301_v47 = vld [vmem:[%s1395_s22 + $0x50] ss:$0 sps:$4 sm:$0x11]  }
  0x19   : > { %v1437_v27 = vsel %vm445_vm0, %v449_v9, %v450_v20  ;;  %v355_v28 = vrot.slane %v353_v21, 1  ;;  %v343_v32 = vrot.slane %v341_v25, 1  ;;  %v401_v33 = vshll.u32 %v1297_v11, 16  ;;  %v1302_v51 = vld [vmem:[%s1395_s22 + $0x20] ss:$0 sps:$4 sm:$0x11]  }
  0x1a   : > { %v382_v34 = vshrl.u32 %v1408_v2, 16  ;;  %v339_v35 = vor.u32 %v338_v29, %v334_v18  ;;  %v398_v36 = vrot.slane %v396_v30, 1  ;;  %v384_v37 = vshll.u32 %v1408_v2, 16  ;;  %v1478_v61 = vld [vmem:[%s1395_s22 + $0x6c] sm:$0xff]  }
  0x1b   : > { %480 = vrot.lane.b32.xlu1 %v1433_v23, %s1339_s24  ;;  %v389_v38 = vshll.u32 %v1294_v3, 16  ;;  %v356_v40 = vsel %vm332_vm1, %v351_v31, %v355_v28  ;;  %v403_v41 = vrot.slane %v401_v33, 1  ;;  %v408_v50 = vshll.u32 %v1445_v39, 16  ;;  %v1308_v3 = vld [vmem:[%s1395_s22 + $0x68] ss:$0 sps:$4 sm:$0x11]  }
  0x1c   : > { %472 = vrot.lane.b32.xlu0 %v1437_v27, %s1339_s24  ;;  %v344_v42 = vsel %vm332_vm1, %v339_v35, %v343_v32  ;;  %v399_v43 = vor.u32 %v398_v36, %v394_v26  ;;  %v386_v44 = vrot.slane %v384_v37, 1  ;;  %v360_v53 = vshll.u32 %v1452_v46, 16  ;;  %v1310_v15 = vld [vmem:[%s1395_s22 + $0x74] ss:$0 sps:$4 sm:$0x11]  }
  0x1d   : > { %v391_v45 = vrot.slane %v389_v38, 1  ;;  %v406_v54 = vshrl.u32 %v1445_v39, 16  ;;  %v410_v55 = vrot.slane %v408_v50, 1  ;;  %v413_v56 = vshll.u32 %v1301_v47, 16  ;;  %v1523_v38 = vld [vmem:[%s1395_s22 + $0x54] sm:$0xff]  }
  0x1e   : > { %v1457_v48 = vsel %vm332_vm1, %v399_v43, %v403_v41  ;;  %v387_v49 = vor.u32 %v386_v44, %v382_v34  ;;  %v365_v58 = vshll.u32 %v1302_v51, 16  ;;  %v358_v59 = vshrl.u32 %v1452_v46, 16  ;;  %v1529_v41 = vld [vmem:[%s1395_s22 + $0x24] sm:$0xff]   ;;  %v1306_v44 = vld [vmem:[%s1395_s22 + $0x2c] ss:$0 sps:$4 sm:$0x11]  }
  0x1f   : > { %431 = vrot.lane.b32.xlu1 %v356_v40, %s1340_s25  ;;  %v362_v60 = vrot.slane %v360_v53, 1  ;;  %v411_v62 = vor.u32 %v410_v55, %v406_v54  ;;  %v415_v63 = vrot.slane %v413_v56, 1  ;;  %v511_v5 = vshrl.u32 %v1470_v57, 16  ;;  %v1312_v55 = vld [vmem:[%s1799_s1 + $0x8] sm:$0xff]  }
  0x20   : > { %429 = vrot.lane.b32.xlu0 %v344_v42, %s1340_s25  ;;  %v1463_v52 = vsel %vm332_vm1, %v387_v49, %v391_v45  ;;  %v513_v6 = vshll.u32 %v1470_v57, 16  ;;  %v367_v7 = vrot.slane %v365_v58, 1  ;;  %v538_v8 = vrot.slane %v1470_v57, 1  ;;  %v1305_v42 = vld [vmem:[%s1395_s22 + $0x5c] ss:$0 sps:$4 sm:$0x11]  }
  0x21   : > { %v363_v9 = vor.u32 %v362_v60, %v358_v59  ;;  %v518_v11 = vshll.u32 %v1308_v3, 16  ;;  %v582_v13 = vshrl.u32 %v1478_v61, 16  ;;  %v539_v14 = vrot.slane %v1308_v3, 1 }
  0x22   : > { %v515_v10 = vrot.slane %v513_v6, 1  ;;  %v584_v16 = vshll.u32 %v1478_v61, 16  ;;  %v609_v17 = vrot.slane %v1478_v61, 1  ;;  %v1493_v18 = vsel %vm332_vm1, %v411_v62, %v415_v63  ;;  %v1313_v62 = vld [vmem:[%s1799_s1 + $0x10] ss:$0 sps:$4 sm:$0x33]  }
  0x23   : > { %439 = vrot.lane.b32.xlu1 %v1457_v48, %s1340_s25  ;;  %v520_v20 = vrot.slane %v518_v11, 1  ;;  %v1497_v21 = vsel %vm445_vm0, %v538_v8, %v539_v14  ;;  %v589_v24 = vshll.u32 %v1310_v15, 16  ;;  %v610_v25 = vrot.slane %v1310_v15, 1 }
  0x24   : > { %437 = vrot.lane.b32.xlu0 %v1463_v52, %s1340_s25  ;;  %v516_v19 = vor.u32 %v515_v10, %v511_v5  ;;  %v586_v22 = vrot.slane %v584_v16, 1  ;;  %v1500_v26 = vsel %vm332_vm1, %v363_v9, %v367_v7  ;;  %v464_v32 = vrot.slane %v1445_v39, 1 }
  0x25   : > { %v591_v30 = vrot.slane %v589_v24, 1  ;;  %v1508_v31 = vsel %vm445_vm0, %v609_v17, %v610_v25  ;;  %v465_v33 = vrot.slane %v1301_v47, 1  ;;  %v452_v35 = vrot.slane %v1452_v46, 1 }
  0x26   : > { %v1503_v28 = vsel %vm332_vm1, %v516_v19, %v520_v20  ;;  %v587_v29 = vor.u32 %v586_v22, %v582_v13  ;;  %v453_v36 = vrot.slane %v1302_v51, 1  ;;  %v420_v43 = vshll.u32 %v1523_v38, 16 }
  0x27   : > { %501 = vrot.lane.b32.xlu1 %v1445_v39, %s1338_s23  ;;  %v1520_v37 = vsel %vm445_vm0, %v464_v32, %v465_v33  ;;  %v372_v45 = vshll.u32 %v1529_v41, 16  ;;  %v418_v47 = vshrl.u32 %v1523_v38, 16  ;;  %v425_v50 = vshll.u32 %v1305_v42, 16 }
  0x28   : > { %493 = vrot.lane.b32.xlu0 %v1452_v46, %s1338_s23  ;;  %v1514_v34 = vsel %vm332_vm1, %v587_v29, %v591_v30  ;;  %v422_v49 = vrot.slane %v420_v43, 1  ;;  %v370_v51 = vshrl.u32 %v1529_v41, 16  ;;  %v377_v54 = vshll.u32 %v1306_v44, 16 }
  0x29   : > { %v374_v53 = vrot.slane %v372_v45, 1  ;;  %v427_v58 = vrot.slane %v425_v50, 1  ;;  %v803_v3 = vsel %vm801_vm2, %v1313_v62, 0  ;;  %v467_v6 = vrot.slane %v1523_v38, 1 }
  0x2a   : > { %v423_v56 = vor.u32 %v422_v49, %v418_v47  ;;  %v379_v60 = vrot.slane %v377_v54, 1  ;;  %v468_v7 = vrot.slane %v1305_v42, 1  ;;  %v455_v8 = vrot.slane %v1529_v41, 1 }
  0x2b   : > { %530 = vrot.lane.b32.xlu1 %v1457_v48, %s1341_s26  ;;  %v375_v59 = vor.u32 %v374_v53, %v370_v51  ;;  %v456_v9 = vrot.slane %v1306_v44, 1 }
  0x2c   : > { %522 = vrot.lane.b32.xlu0 %v356_v40, %s1341_s26  ;;  %v454_v40 = vsel %vm445_vm0, %v452_v35, %v453_v36  ;;  %v428_v63 = vsel %vm332_vm1, %v423_v56, %v427_v58  ;;  %v469_v10 = vsel %vm445_vm0, %v467_v6, %v468_v7 }
  0x2d   : > { %v380_v5 = vsel %vm332_vm1, %v375_v59, %v379_v60  ;;  %v457_v11 = vsel %vm445_vm0, %v455_v8, %v456_v9 }
  0x2f   : > { %532 = vrot.lane.b32.xlu1 %v1493_v18, %s1341_s26 }
  0x30   : > { %524 = vrot.lane.b32.xlu0 %v1500_v26, %s1341_s26 }
  0x33   : > { %549 = vrot.lane.b32.xlu1 %v1433_v23, %s1342_s27 }
  0x34   : > { %541 = vrot.lane.b32.xlu0 %v1437_v27, %s1342_s27  ;;  %v1311_v27 = vld [vmem:[%s1799_s1] sm:$0xff]  }
  0x35   : > { %1228 = vmatprep.subr.bf16.mxu0 %v1311_v27  ;;  %1250 = vmatprep.subr.bf16.mxu1 %v1311_v27 }
  0x36   : > { %1229 = vmatpush3.bf16.msra.mxu0 %v1311_v27  ;;  %1253 = vmatpush3.bf16.msra.mxu1 %v1311_v27 }
  0x37   : > { %551 = vrot.lane.b32.xlu1 %v1520_v37, %s1342_s27  ;;  %1230 = vmatprep.subr.bf16.mxu0 %v1312_v55 }
  0x38   : > { %543 = vrot.lane.b32.xlu0 %v454_v40, %s1342_s27  ;;  %1251 = vmatprep.subr.bf16.mxu1 %v1312_v55 }
  0x3a   : > { %1231 = vmatpush3.bf16.msra.mxu0 %v1312_v55  ;;  %1254 = vmatpush3.bf16.msra.mxu1 %v1312_v55 }
  0x3b   : > { %570 = vrot.lane.b32.xlu1 %v1445_v39, %s1343_s28  ;;  %1256 = vmatprep.subr.msk.bf16.mxu0 %vm801_vm2, %v1313_v62 }
  0x3c   : > { %562 = vrot.lane.b32.xlu0 %v1452_v46, %s1343_s28  ;;  %1257 = vmatprep.subr.msk.bf16.mxu1 %vm801_vm2, %v1313_v62 }
  0x3e   : > { %1233 = vmatpush3.bf16.msra.mxu0 %v803_v3  ;;  %1255 = vmatpush3.bf16.msra.mxu1 %v803_v3 }
  0x3f   : > { %572 = vrot.lane.b32.xlu1 %v1523_v38, %s1343_s28 }
  0x40   : > { %564 = vrot.lane.b32.xlu0 %v1529_v41, %s1343_s28 }
  0x43   : > { %601 = vrot.lane.b32.xlu1 %v1493_v18, %s1344_s7 }
  0x44   : > { %593 = vrot.lane.b32.xlu0 %v1500_v26, %s1344_s7 }
  0x47   : > { %603 = vrot.lane.b32.xlu1 %v428_v63, %s1344_s7 }
  0x48   : > { %595 = vrot.lane.b32.xlu0 %v380_v5, %s1344_s7 }
  0x4b   : > { %620 = vrot.lane.b32.xlu1 %v1520_v37, %s1345_s10 }
  0x4c   : > { %612 = vrot.lane.b32.xlu0 %v454_v40, %s1345_s10 }
  0x4f   : > { %441 = vrot.lane.b32.xlu1 %v1493_v18, %s1340_s25 }
  0x50   : > { %433 = vrot.lane.b32.xlu0 %v1500_v26, %s1340_s25 }
  0x53   : > { %622 = vrot.lane.b32.xlu1 %v469_v10, %s1345_s10 }
  0x54   : > { %614 = vrot.lane.b32.xlu0 %v457_v11, %s1345_s10 }
  0x57   : > { %443 = vrot.lane.b32.xlu1 %v428_v63, %s1340_s25 }
  0x58   : > { %435 = vrot.lane.b32.xlu0 %v380_v5, %s1340_s25 }
  0x5b   : > { %482 = vrot.lane.b32.xlu1 %v1520_v37, %s1339_s24 }
  0x5c   : > { %474 = vrot.lane.b32.xlu0 %v454_v40, %s1339_s24 }
  0x5f   : > { %484 = vrot.lane.b32.xlu1 %v469_v10, %s1339_s24 }
  0x60   : > { %476 = vrot.lane.b32.xlu0 %v457_v11, %s1339_s24 }
  0x63   : > { %503 = vrot.lane.b32.xlu1 %v1523_v38, %s1338_s23 }
  0x64   : > { %495 = vrot.lane.b32.xlu0 %v1529_v41, %s1338_s23 }
  0x67   : > { %505 = vrot.lane.b32.xlu1 %v1470_v57, %s1338_s23 }
  0x68   : > { %497 = vrot.lane.b32.xlu0 %v1408_v2, %s1338_s23 }
  0x6b   : > { %534 = vrot.lane.b32.xlu1 %v428_v63, %s1341_s26 }
  0x6c   : > { %526 = vrot.lane.b32.xlu0 %v380_v5, %s1341_s26 }
  0x6f   : > { %536 = vrot.lane.b32.xlu1 %v1503_v28, %s1341_s26 }
  0x70   : > { %528 = vrot.lane.b32.xlu0 %v1463_v52, %s1341_s26 }
  0x73   : > { %553 = vrot.lane.b32.xlu1 %v469_v10, %s1342_s27 }
  0x74   : > { %545 = vrot.lane.b32.xlu0 %v457_v11, %s1342_s27 }
  0x77   : > { %555 = vrot.lane.b32.xlu1 %v1497_v21, %s1342_s27 }
  0x78   : > { %547 = vrot.lane.b32.xlu0 %v1421_v12, %s1342_s27 }
  0x7b   : > { %574 = vrot.lane.b32.xlu1 %v1470_v57, %s1343_s28 }
  0x7c   : > { %566 = vrot.lane.b32.xlu0 %v1408_v2, %s1343_s28 }
  0x7f   : > { %576 = vrot.lane.b32.xlu1 %v1478_v61, %s1343_s28 }
  0x80   : > { %568 = vrot.lane.b32.xlu0 %v1398_v0, %s1343_s28 }
  0x83   : > { %605 = vrot.lane.b32.xlu1 %v1503_v28, %s1344_s7 }
  0x84   : > { %597 = vrot.lane.b32.xlu0 %v1463_v52, %s1344_s7 }
  0x85   : > { %v500_v13 = vpop.permute.xlu1 %499  ;;  %v492_v14 = vpop.permute.xlu0 %491 }
  0x87   : > { %607 = vrot.lane.b32.xlu1 %v1514_v34, %s1344_s7 }
  0x88   : > { %599 = vrot.lane.b32.xlu0 %v1457_v48, %s1344_s7 }
  0x89   : > { %v479_v57 = vpop.permute.xlu1 %478 }
  0x8a   : > { %v471_v15 = vpop.permute.xlu0 %470 }
  0x8b   : > { %624 = vrot.lane.b32.xlu1 %v1497_v21, %s1345_s10 }
  0x8c   : > { %616 = vrot.lane.b32.xlu0 %v1421_v12, %s1345_s10 }
  0x8d   : > { %v481_v61 = vpop.permute.xlu1 %480 }
  0x8e   : > { %v473_v16 = vpop.permute.xlu0 %472 }
  0x8f   : > { %626 = vrot.lane.b32.xlu1 %v1508_v31, %s1345_s10 }
  0x90   : > { %618 = vrot.lane.b32.xlu0 %v1433_v23, %s1345_s10 }
  0x91   : > { %v432_v52 = vpop.permute.xlu1 %431 }
  0x92   : > { %v430_v17 = vpop.permute.xlu0 %429  ;;  %v632_v56 = vsel %vm628_vm3, %v1401_v1, %v432_v52 }
  0x93   : > { %v630_v34 = vsel %vm628_vm3, %v1412_v4, %v430_v17  ;;  %v649_v3 = vsel %vm645_vm4, %v632_v56, %v473_v16 }
  0x94   : > { %v647_v40 = vsel %vm645_vm4, %v630_v34, %v471_v15 }
  0x95   : > { %v440_v18 = vpop.permute.xlu1 %439  ;;  %v664_v44 = vsel %vm662_vm6, %v647_v40, %v492_v14 }
  0x96   : > { %v438_v48 = vpop.permute.xlu0 %437  ;;  %v640_v49 = vsel %vm628_vm3, %v1398_v0, %v440_v18 }
  0x97   : > { %v638_v23 = vsel %vm628_vm3, %v1408_v2, %v438_v48  ;;  %v657_v60 = vsel %vm645_vm4, %v640_v49, %v481_v61 }
  0x98   : > { %v655_v36 = vsel %vm645_vm4, %v638_v23, %v479_v57 }
  0x99   : > { %v502_v19 = vpop.permute.xlu1 %501  ;;  %v672_v42 = vsel %vm662_vm6, %v655_v36, %v500_v13 }
  0x9a   : > { %v494_v20 = vpop.permute.xlu0 %493  ;;  %v674_v62 = vsel %vm662_vm6, %v657_v60, %v502_v19 }
  0x9b   : > { %v666_v1 = vsel %vm662_vm6, %v649_v3, %v494_v20 }
  0x9d   : > { %v531_v22 = vpop.permute.xlu1 %530 }
  0x9e   : > { %v523_v24 = vpop.permute.xlu0 %522  ;;  %v689_v2 = vsel %vm679_vm5, %v672_v42, %v531_v22 }
  0x9f   : > { %v681_v27 = vsel %vm679_vm5, %v664_v44, %v523_v24 }
  0xa1   : > { %v533_v21 = vpop.permute.xlu1 %532 }
  0xa2   : > { %v525_v25 = vpop.permute.xlu0 %524  ;;  %v691_v5 = vsel %vm679_vm5, %v674_v62, %v533_v21 }
  0xa3   : > { %v683_v8 = vsel %vm679_vm5, %v666_v1, %v525_v25 }
  0xa5   : > { %v550_v26 = vpop.permute.xlu1 %549 }
  0xa6   : > { %v542_v12 = vpop.permute.xlu0 %541  ;;  %v706_v4 = vsel %vm696_vm7, %v689_v2, %v550_v26 }
  0xa7   : > { %v698_v50 = vsel %vm696_vm7, %v681_v27, %v542_v12 }
  0xa9   : > { %v552_v28 = vpop.permute.xlu1 %551 }
  0xaa   : > { %v544_v29 = vpop.permute.xlu0 %543  ;;  %v708_v6 = vsel %vm696_vm7, %v691_v5, %v552_v28 }
  0xab   : > { %v700_v10 = vsel %vm696_vm7, %v683_v8, %v544_v29 }
  0xad   : > { %v571_v30 = vpop.permute.xlu1 %570 }
  0xae   : > { %v563_v32 = vpop.permute.xlu0 %562  ;;  %v723_v47 = vsel %vm713_vm8, %v706_v4, %v571_v30 }
  0xaf   : > { %v715_v54 = vsel %vm713_vm8, %v698_v50, %v563_v32 }
  0xb1   : > { %v573_v31 = vpop.permute.xlu1 %572 }
  0xb2   : > { %v565_v33 = vpop.permute.xlu0 %564  ;;  %v725_v9 = vsel %vm713_vm8, %v708_v6, %v573_v31 }
  0xb3   : > { %v717_v14 = vsel %vm713_vm8, %v700_v10, %v565_v33 }
  0xb5   : > { %v602_v35 = vpop.permute.xlu1 %601 }
  0xb6   : > { %v594_v37 = vpop.permute.xlu0 %593  ;;  %v740_v51 = vsel %vm730_vm9, %v723_v47, %v602_v35 }
  0xb7   : > { %v732_v58 = vsel %vm730_vm9, %v715_v54, %v594_v37 }
  0xb9   : > { %v604_v43 = vpop.permute.xlu1 %603 }
  0xba   : > { %v596_v45 = vpop.permute.xlu0 %595  ;;  %v742_v11 = vsel %vm730_vm9, %v725_v9, %v604_v43 }
  0xbb   : > { %v734_v15 = vsel %vm730_vm9, %v717_v14, %v596_v45 }
  0xbd   : > { %v621_v53 = vpop.permute.xlu1 %620 }
  0xbe   : > { %v757_v55 = vsel %vm747_vm10, %v740_v51, %v621_v53  ;;  %v613_v59 = vpop.permute.xlu0 %612 }
  0xbf   : > { %1242 = vmatprep.mubr.msk.bf16.mxu1 %vm784_vm11, %v757_v55  ;;  %v749_v0 = vsel %vm747_vm10, %v732_v58, %v613_v59 }
  0xc0   : > { %1234 = vmatprep.mubr.msk.bf16.mxu0 %vm784_vm11, %v749_v0 }
  0xc1   : > { %v442_v63 = vpop.permute.xlu1 %441 }
  0xc2   : > { %v434_v7 = vpop.permute.xlu0 %433  ;;  %v642_v40 = vsel %vm628_vm3, %v1445_v39, %v442_v63 }
  0xc3   : > { %v634_v2 = vsel %vm628_vm3, %v1452_v46, %v434_v7 }
  0xc5   : > { %v623_v13 = vpop.permute.xlu1 %622 }
  0xc6   : > { %v759_v57 = vsel %vm747_vm10, %v742_v11, %v623_v13  ;;  %v615_v61 = vpop.permute.xlu0 %614 }
  0xc7   : > { %1243 = vmatmul.mubr.msk.bf16.vlgmr.msra.gmra.mrb[0].mxu1 %vm784_vm11, %v759_v57  ;;  %v751_v16 = vsel %vm747_vm10, %v734_v15, %v615_v61  ;;  %v1712_v61 = vld [vmem:[%s1800_s2] ss:$0 sm:$0xff] }
  0xc8   : > { %1235 = vmatmul.mubr.msk.bf16.vlgmr.msra.gmra.mrb[0].mxu0 %vm784_vm11, %v751_v16  ;;  %v1717_v16 = vld [vmem:[%s1801_s3] ss:$0 sm:$0xff] }
  0xc9   : > { %v444_v52 = vpop.permute.xlu1 %443 }
  0xca   : > { %v436_v17 = vpop.permute.xlu0 %435  ;;  %v644_v47 = vsel %vm628_vm3, %v1523_v38, %v444_v52 }
  0xcb   : > { %v636_v54 = vsel %vm628_vm3, %v1529_v41, %v436_v17 }
  0xcd   : > { %v483_v18 = vpop.permute.xlu1 %482 }
  0xce   : > { %v475_v48 = vpop.permute.xlu0 %474  ;;  %v659_v43 = vsel %vm645_vm4, %v642_v40, %v483_v18 }
  0xcf   : > { %v651_v45 = vsel %vm645_vm4, %v634_v2, %v475_v48 }
  0xd1   : > { %v485_v19 = vpop.permute.xlu1 %484 }
  0xd2   : > { %v477_v20 = vpop.permute.xlu0 %476  ;;  %v661_v51 = vsel %vm645_vm4, %v644_v47, %v485_v19 }
  0xd3   : > { %v653_v59 = vsel %vm645_vm4, %v636_v54, %v477_v20 }
  0xd5   : > { %v504_v22 = vpop.permute.xlu1 %503 }
  0xd6   : > { %v496_v24 = vpop.permute.xlu0 %495  ;;  %v676_v44 = vsel %vm662_vm6, %v659_v43, %v504_v22 }
  0xd7   : > { %v668_v49 = vsel %vm662_vm6, %v651_v45, %v496_v24 }
  0xd9   : > { %v506_v21 = vpop.permute.xlu1 %505 }
  0xda   : > { %v498_v25 = vpop.permute.xlu0 %497  ;;  %v678_v55 = vsel %vm662_vm6, %v661_v51, %v506_v21 }
  0xdb   : > { %v670_v63 = vsel %vm662_vm6, %v653_v59, %v498_v25 }
  0xdd   : > { %v535_v26 = vpop.permute.xlu1 %534 }
  0xde   : > { %v527_v12 = vpop.permute.xlu0 %526  ;;  %v693_v27 = vsel %vm679_vm5, %v676_v44, %v535_v26 }
  0xdf   : > { %v685_v53 = vsel %vm679_vm5, %v668_v49, %v527_v12 }
  0xe1   : > { %v537_v28 = vpop.permute.xlu1 %536 }
  0xe2   : > { %v529_v29 = vpop.permute.xlu0 %528  ;;  %v695_v60 = vsel %vm679_vm5, %v678_v55, %v537_v28 }
  0xe3   : > { %v687_v1 = vsel %vm679_vm5, %v670_v63, %v529_v29 }
  0xe5   : > { %v554_v30 = vpop.permute.xlu1 %553 }
  0xe6   : > { %v546_v32 = vpop.permute.xlu0 %545  ;;  %v710_v39 = vsel %vm696_vm7, %v693_v27, %v554_v30 }
  0xe7   : > { %v702_v56 = vsel %vm696_vm7, %v685_v53, %v546_v32 }
  0xe9   : > { %v556_v31 = vpop.permute.xlu1 %555 }
  0xea   : > { %v548_v23 = vpop.permute.xlu0 %547  ;;  %v712_v3 = vsel %vm696_vm7, %v695_v60, %v556_v31 }
  0xeb   : > { %v704_v8 = vsel %vm696_vm7, %v687_v1, %v548_v23 }
  0xed   : > { %v575_v33 = vpop.permute.xlu1 %574 }
  0xee   : > { %v567_v34 = vpop.permute.xlu0 %566  ;;  %v727_v46 = vsel %vm713_vm8, %v710_v39, %v575_v33 }
  0xef   : > { %v719_v0 = vsel %vm713_vm8, %v702_v56, %v567_v34 }
  0xf1   : > { %v577_v35 = vpop.permute.xlu1 %576 }
  0xf2   : > { %v569_v36 = vpop.permute.xlu0 %568  ;;  %v729_v6 = vsel %vm713_vm8, %v712_v3, %v577_v35 }
  0xf3   : > { %v721_v11 = vsel %vm713_vm8, %v704_v8, %v569_v36 }
  0xf5   : > { %v606_v37 = vpop.permute.xlu1 %605 }
  0xf6   : > { %v598_v42 = vpop.permute.xlu0 %597  ;;  %v744_v38 = vsel %vm730_vm9, %v727_v46, %v606_v37 }
  0xf7   : > { %v736_v41 = vsel %vm730_vm9, %v719_v0, %v598_v42 }
  0xf9   : > { %v608_v4 = vpop.permute.xlu1 %607 }
  0xfa   : > { %v600_v50 = vpop.permute.xlu0 %599  ;;  %v746_v9 = vsel %vm730_vm9, %v729_v6, %v608_v4 }
  0xfb   : > { %v738_v14 = vsel %vm730_vm9, %v721_v11, %v600_v50 }
  0xfd   : > { %v625_v58 = vpop.permute.xlu1 %624 }
  0xfe   : > { %v761_v62 = vsel %vm747_vm10, %v744_v38, %v625_v58  ;;  %v617_v5 = vpop.permute.xlu0 %616 }
  0xff   : > { %1246 = vmatprep.mubr.msk.bf16.mxu1 %vm784_vm11, %v761_v62  ;;  %v753_v7 = vsel %vm747_vm10, %v736_v41, %v617_v5 }
 0x100   : > { %1238 = vmatprep.mubr.msk.bf16.mxu0 %vm784_vm11, %v753_v7 }
 0x101   : > { %v627_v10 = vpop.permute.xlu1 %626 }
 0x102   : > { %v763_v13 = vsel %vm747_vm10, %v746_v9, %v627_v10  ;;  %v619_v57 = vpop.permute.xlu0 %618 }
 0x103   : > { %1247 = vmatmul.mubr.msk.bf16.gmra.mrb[4].mxu1 %vm784_vm11, %v763_v13  ;;  %v755_v15 = vsel %vm747_vm10, %v738_v14, %v619_v57 }
 0x104   : > { %1239 = vmatmul.mubr.msk.bf16.gmra.mrb[4].mxu0 %vm784_vm11, %v755_v15 }
 0x19a   : > { %v1244_v52 = vpop.f32.mrb[0].mxu1 }
 0x19b   : > { %v919_v17 = vmul.f32 %v1244_v52, %v1712_v61  ;;  %v871_v18 = vpop.f32.mrb[1].mxu1  ;;  %v1236_v48 = vpop.f32.mrb[0].mxu0 }
 0x19c   : > { %v917_v19 = vmul.f32 %v1712_v61, %v871_v18  ;;  %v1245_v20 = vpop.f32.mrb[2].mxu1  ;;  %v911_v22 = vmul.f32 %v1236_v48, %v1712_v61  ;;  %v839_v21 = vpop.f32.mrb[1].mxu0 }
 0x19d   : > { %v942_v24 = vadd.f32 %v1717_v16, %v919_v17  ;;  %v920_v25 = vmul.f32 %v1245_v20, %v1712_v61  ;;  %v874_v26 = vpop.f32.mrb[3].mxu1  ;;  %v909_v12 = vmul.f32 %v1712_v61, %v839_v21  ;;  %v1237_v29 = vpop.f32.mrb[2].mxu0 }
 0x19e   : > { %v940_v28 = vadd.f32 %v1717_v16, %v917_v19  ;;  %v918_v30 = vmul.f32 %v1712_v61, %v874_v26  ;;  %v934_v32 = vadd.f32 %v1717_v16, %v911_v22  ;;  %v912_v23 = vmul.f32 %v1237_v29, %v1712_v61  ;;  %v842_v34 = vpop.f32.mrb[3].mxu0 }
 0x19f   : > { %v958_v31 = vmax.f32 %v942_v24, 0.0  ;;  %v943_v33 = vadd.f32 %v1717_v16, %v920_v25  ;;  %v932_v35 = vadd.f32 %v1717_v16, %v909_v12  ;;  %v910_v37 = vmul.f32 %v1712_v61, %v842_v34 }
 0x1a0   : > { %v956_v36 = vmax.f32 %v940_v28, 0.0  ;;  %v941_v40 = vadd.f32 %v1717_v16, %v918_v30  ;;  %v950_v42 = vmax.f32 %v934_v32, 0.0  ;;  %v935_v2 = vadd.f32 %v1717_v16, %v912_v23 }
 0x1a1   : > { %v1211_v43 = vpack.c.bf16 %v958_v31, %v958_v31  ;;  %v959_v44 = vmax.f32 %v943_v33, 0.0  ;;  %v948_v4 = vmax.f32 %v932_v35, 0.0  ;;  %v933_v27 = vadd.f32 %v1717_v16, %v910_v37 }
 0x1a2   : > { %v1209_v45 = vpack.c.bf16 %v956_v36, %v956_v36  ;;  %v957_v47 = vmax.f32 %v941_v40, 0.0  ;;  %v1203_v49 = vpack.c.bf16 %v950_v42, %v950_v42  ;;  %v951_v39 = vmax.f32 %v935_v2, 0.0 }
 0x1a3   : > { %1039 = vst.msk [vmem:[%s1734_s21 + $0x28] sm:$0xf] %vm1028_vm12, %v1211_v43  ;;  %v1212_v50 = vpack.c.bf16 %v959_v44, %v959_v44  ;;  %v1201_v51 = vpack.c.bf16 %v948_v4, %v948_v4  ;;  %v949_v53 = vmax.f32 %v933_v27, 0.0 }
 0x1a4   : > { %1037 = vst.msk [vmem:[%s1734_s21 + $0x20] sm:$0xf] %vm1028_vm12, %v1209_v45  ;;  %v1210_v46 = vpack.c.bf16 %v957_v47, %v957_v47  ;;  %1031 = vst.msk [vmem:[%s1734_s21 + $0x8] sm:$0xf] %vm1028_vm12, %v1203_v49  ;;  %v1204_v54 = vpack.c.bf16 %v951_v39, %v951_v39 }
 0x1a5   : > { %1040 = vst.msk [vmem:[%s1734_s21 + $0x2c] sm:$0xf] %vm1028_vm12, %v1212_v50  ;;  %1029 = vst.msk [vmem:[%s1734_s21] sm:$0xf] %vm1028_vm12, %v1201_v51  ;;  %v1202_v55 = vpack.c.bf16 %v949_v53, %v949_v53 }
 0x1a6   : > { %1038 = vst.msk [vmem:[%s1734_s21 + $0x24] sm:$0xf] %vm1028_vm12, %v1210_v46  ;;  %1032 = vst.msk [vmem:[%s1734_s21 + $0xc] sm:$0xf] %vm1028_vm12, %v1204_v54 }
 0x1a7   : > { %1030 = vst.msk [vmem:[%s1734_s21 + $0x4] sm:$0xf] %vm1028_vm12, %v1202_v55 }
 0x1d6   : > { %v1248_v56 = vpop.f32.mrb[4].mxu1 }
 0x1d7   : > { %v923_v38 = vmul.f32 %v1248_v56, %v1712_v61  ;;  %v887_v58 = vpop.f32.mrb[5].mxu1  ;;  %v1240_v59 = vpop.f32.mrb[4].mxu0 }
 0x1d8   : > { %v921_v60 = vmul.f32 %v1712_v61, %v887_v58  ;;  %v1249_v0 = vpop.f32.mrb[6].mxu1  ;;  %v915_v62 = vmul.f32 %v1240_v59, %v1712_v61  ;;  %v855_v3 = vpop.f32.mrb[5].mxu0 }
 0x1d9   : > { %v946_v63 = vadd.f32 %v1717_v16, %v923_v38  ;;  %v924_v41 = vmul.f32 %v1249_v0, %v1712_v61  ;;  %v890_v5 = vpop.f32.mrb[7].mxu1  ;;  %v913_v1 = vmul.f32 %v1712_v61, %v855_v3  ;;  %v1241_v7 = vpop.f32.mrb[6].mxu0 }
 0x1da   : > { %v944_v6 = vadd.f32 %v1717_v16, %v921_v60  ;;  %v922_v8 = vmul.f32 %v1712_v61, %v890_v5  ;;  %v938_v9 = vadd.f32 %v1717_v16, %v915_v62  ;;  %v916_v11 = vmul.f32 %v1241_v7, %v1712_v61  ;;  %v858_v14 = vpop.f32.mrb[7].mxu0 }
 0x1db   : > { %v962_v10 = vmax.f32 %v946_v63, 0.0  ;;  %v947_v13 = vadd.f32 %v1717_v16, %v924_v41  ;;  %v936_v57 = vadd.f32 %v1717_v16, %v913_v1  ;;  %v914_v52 = vmul.f32 %v1712_v61, %v858_v14 }
 0x1dc   : > { %v960_v15 = vmax.f32 %v944_v6, 0.0  ;;  %v945_v17 = vadd.f32 %v1717_v16, %v922_v8  ;;  %v954_v18 = vmax.f32 %v938_v9, 0.0  ;;  %v939_v19 = vadd.f32 %v1717_v16, %v916_v11 }
 0x1dd   : > { %v1215_v48 = vpack.c.bf16 %v962_v10, %v962_v10  ;;  %v963_v20 = vmax.f32 %v947_v13, 0.0  ;;  %v952_v22 = vmax.f32 %v936_v57, 0.0  ;;  %v937_v21 = vadd.f32 %v1717_v16, %v914_v52 }
 0x1de   : > { %v1213_v24 = vpack.c.bf16 %v960_v15, %v960_v15  ;;  %v961_v25 = vmax.f32 %v945_v17, 0.0  ;;  %v1207_v26 = vpack.c.bf16 %v954_v18, %v954_v18  ;;  %v955_v61 = vmax.f32 %v939_v19, 0.0 }
 0x1df   : > { %1043 = vst.msk [vmem:[%s1734_s21 + $0x38] sm:$0xf] %vm1028_vm12, %v1215_v48  ;;  %v1216_v12 = vpack.c.bf16 %v963_v20, %v963_v20  ;;  %v1205_v28 = vpack.c.bf16 %v952_v22, %v952_v22  ;;  %v953_v29 = vmax.f32 %v937_v21, 0.0 }
 0x1e0   : > { %1041 = vst.msk [vmem:[%s1734_s21 + $0x30] sm:$0xf] %vm1028_vm12, %v1213_v24  ;;  %v1214_v30 = vpack.c.bf16 %v961_v25, %v961_v25  ;;  %1035 = vst.msk [vmem:[%s1734_s21 + $0x18] sm:$0xf] %vm1028_vm12, %v1207_v26  ;;  %v1208_v32 = vpack.c.bf16 %v955_v61, %v955_v61 }
 0x1e1   : > { %1044 = vst.msk [vmem:[%s1734_s21 + $0x3c] sm:$0xf] %vm1028_vm12, %v1216_v12  ;;  %1033 = vst.msk [vmem:[%s1734_s21 + $0x10] sm:$0xf] %vm1028_vm12, %v1205_v28  ;;  %v1206_v16 = vpack.c.bf16 %v953_v29, %v953_v29 }
 0x1e2   : > { %1042 = vst.msk [vmem:[%s1734_s21 + $0x34] sm:$0xf] %vm1028_vm12, %v1214_v30  ;;  %1036 = vst.msk [vmem:[%s1734_s21 + $0x1c] sm:$0xf] %vm1028_vm12, %v1208_v32 }
 0x1e3   : > { %1034 = vst.msk [vmem:[%s1734_s21 + $0x14] sm:$0xf] %vm1028_vm12, %v1206_v16 }
 0x1e4 PF: > { %s14_s17 = sadd.s32 1, %s1336_s17   ;;  %s1803_s15 = smov %s1332_s16 }
 0x1e5   : > { %p11_p5 = scmp.ge.s32.totalorder %s14_s17, 4   ;;  %s1804_s16 = smov %s1806_s18 }
 0x1e7   :  { %13 = sbr.rel (!%p11_p5) target bundleno = 2 (0x2), region = 66 }

</bundles_post_ra>
